<compile_context>
chip_gen: v6e
topology: v6e:2x2x1
jax: 0.10.0
libtpu: 0.0.40
codegen_flags: <defaults>
</compile_context>

<pallas_src>
import math

import jax
import jax.numpy as jnp
from jax.experimental import pallas as pl
from jax.experimental.pallas import tpu as pltpu


def _pick_row_tile(Ho, Wo, cout_padded, acc_budget_bytes=2 << 20):
    """Output row-tile TH: must divide Ho and be a multiple of 8 (or equal Ho).

    Keeps the f32 accumulator (TH*Wo, Cout_padded) under ~2 MiB so it stays
    well inside the vreg file / VMEM without spills.
    """
    if Ho % 8 != 0:
        return Ho  # full-extent block is always a legal block dim
    divisors = [t for t in range(8, Ho, 8) if Ho % t == 0]
    for t in sorted(divisors, reverse=True):
        if t * Wo * cout_padded * 4 <= acc_budget_bytes:
            return t
    return divisors[0] if divisors else Ho


def _vmem_limit_bytes(in_block_bytes, w_bytes, out_block_bytes):
    # double-buffered activation/output blocks + weight + headroom for temporaries
    need = 2 * (in_block_bytes + out_block_bytes) + 2 * w_bytes + (8 << 20)
    return int(min(max(need, 32 << 20), 100 << 20))


def _make_conv_kernel(KH, KW, TH, Wo, Cin, stride, scale):
    """Row-block direct convolution.

    Each grid step computes TH output rows for one batch element.  Every kernel
    tap is one 2-D MXU matmul with M = TH*Wo and K = Cin, accumulated in f32.
    """

    def kernel(x_ref, w_ref, o_ref):
        # x_ref: (1, Hp, Wp, Cin)     whole padded image for one batch element
        # w_ref: (KH*KW, Cin, Cp)     unscaled weight, Cout padded to 128-lane multiple
        # o_ref: (1, TH*Wo, Cp)       lane-dense flattened output row block
        h = pl.program_id(1)
        row0 = h * (TH * stride)
        if (TH * stride) % 8 == 0:
            row0 = pl.multiple_of(row0, 8)

        cp = o_ref.shape[-1]
        acc = jnp.zeros((TH * Wo, cp), jnp.float32)
        for kh in range(KH):
            for kw in range(KW):
                if stride == 1:
                    patch = x_ref[0, pl.ds(row0 + kh, TH), kw:kw + Wo, :]
                else:
                    # TODO(synk): contiguous load + reshape de-interleave is cheaper.
                    patch = x_ref[0, pl.ds(row0 + kh, TH, stride),
                                  pl.ds(kw, Wo, stride), :]
                # Merge the two free spatial dims (layout-preserving) and feed
                # the MXU a canonical 2-D matmul; f32 accumulation.
                lhs = patch.reshape(TH * Wo, Cin)
                acc = acc + jnp.dot(lhs, w_ref[kh * KW + kw],
                                    preferred_element_type=jnp.float32)
        # Weight scale applied once (linear in the weight, so exact), then cast.
        o_ref[0] = (acc * scale).astype(o_ref.dtype)

    return kernel


def weight_scaled_conv2d(x_nchw, weight_oihw, *, stride=1, padding=0, groups=1):
    """Forward pass of WeightScaledConv2d (upsample=False, groups=1)."""
    N, Cin, H, W = x_nchw.shape
    Cout, Cin_w, KH, KW = weight_oihw.shape
    assert groups == 1 and Cin_w == Cin, "groups != 1 not supported"
    # TODO(synk): the .deconv() (conv_transpose2d / upsample) path is not implemented.

    scale = math.sqrt(2.0 / (Cin * KH * KW))
    out_dtype = x_nchw.dtype

    # NCHW -> NHWC ; OIHW -> (KH, KW, Cin, Cout)
    x = jnp.transpose(x_nchw, (0, 2, 3, 1))
    w = jnp.transpose(weight_oihw, (2, 3, 1, 0))

    # Lane-dense output: pad Cout up to a multiple of 128 (zero columns) so the
    # kernel's output block last dim is a full 128-lane multiple.
    Cp = max(128, ((Cout + 127) // 128) * 128)
    if Cp != Cout:
        w = jnp.pad(w, ((0, 0), (0, 0), (0, 0), (0, Cp - Cout)))
    w = w.reshape(KH * KW, Cin, Cp)

    if padding:
        # TODO(synk): fold zero-padding into the kernel to avoid the extra HBM copy.
        x = jnp.pad(x, ((0, 0), (padding, padding), (padding, padding), (0, 0)))

    Hp, Wp = x.shape[1], x.shape[2]
    Ho = (Hp - KH) // stride + 1
    Wo = (Wp - KW) // stride + 1

    TH = _pick_row_tile(Ho, Wo, Cp)
    assert Ho % TH == 0
    n_hblk = Ho // TH

    kernel = _make_conv_kernel(KH, KW, TH, Wo, Cin, stride, scale)

    itemsize = jnp.dtype(x.dtype).itemsize
    in_block_bytes = Hp * Wp * Cin * itemsize
    w_bytes = int(w.size) * jnp.dtype(w.dtype).itemsize
    out_block_bytes = TH * Wo * Cp * jnp.dtype(out_dtype).itemsize
    vmem_limit = _vmem_limit_bytes(in_block_bytes, w_bytes, out_block_bytes)

    flops = int(2 * N * Ho * Wo * Cp * KH * KW * Cin)
    bytes_accessed = int(x.size * itemsize + w_bytes
                         + N * Ho * Wo * Cp * jnp.dtype(out_dtype).itemsize)

    out_flat = pl.pallas_call(
        kernel,
        out_shape=jax.ShapeDtypeStruct((N, Ho * Wo, Cp), out_dtype),
        grid_spec=pltpu.PrefetchScalarGridSpec(
            num_scalar_prefetch=0,
            grid=(N, n_hblk),
            in_specs=[
                # Whole padded image per batch element; index constant over the
                # row-block axis -> DMA'd once per n, reused for every row block.
                pl.BlockSpec((1, Hp, Wp, Cin), lambda n, h: (n, 0, 0, 0)),
                # Weight: constant index_map -> fetched once, stays resident.
                pl.BlockSpec((KH * KW, Cin, Cp), lambda n, h: (0, 0, 0)),
            ],
            out_specs=pl.BlockSpec((1, TH * Wo, Cp), lambda n, h: (n, h, 0)),
        ),
        compiler_params=pltpu.CompilerParams(
            dimension_semantics=("parallel", "parallel"),
            vmem_limit_bytes=vmem_limit,
        ),
        cost_estimate=pl.CostEstimate(
            flops=flops, transcendentals=0, bytes_accessed=bytes_accessed),
    )(x, w)

    # Drop Cout padding, unflatten spatial, NHWC -> NCHW.
    out_nhwc = out_flat[:, :, :Cout].reshape(N, Ho, Wo, Cout)
    return jnp.transpose(out_nhwc, (0, 3, 1, 2))


def _reference_conv2d(x_nchw, weight_oihw, *, stride=1, padding=0):
    scale = math.sqrt(
        2.0 / (weight_oihw.shape[1] * weight_oihw.shape[2] * weight_oihw.shape[3]))
    return jax.lax.conv_general_dilated(
        x_nchw,
        weight_oihw * scale,
        window_strides=(stride, stride),
        padding=[(padding, padding), (padding, padding)],
        dimension_numbers=("NCHW", "OIHW", "NCHW"),
    )


if __name__ == "__main__":
    # Module hyperparameters (analogous to WeightScaledConv2d(4, 8, 3, stride=1, padding=1))
    input_nc, output_nc, kernel_size = 4, 8, 3
    stride, padding = 1, 1
    N, H, W = 2, 16, 16

    key = jax.random.PRNGKey(0)
    kx, kw = jax.random.split(key)
    x = jax.random.normal(kx, (N, input_nc, H, W), dtype=jnp.float32)
    # torch.randn(output_nc, input_nc // groups, k, k) -> deterministic normal init
    weight = jax.random.normal(
        kw, (output_nc, input_nc, kernel_size, kernel_size), dtype=jnp.float32)

    out = weight_scaled_conv2d(x, weight, stride=stride, padding=padding)
    out = jax.block_until_ready(out)

    ref = _reference_conv2d(x, weight, stride=stride, padding=padding)
    assert out.shape == ref.shape, (out.shape, ref.shape)
    assert jnp.allclose(out, ref, atol=1e-4, rtol=1e-4), "mismatch vs reference conv"

    print("KERNEL_OK")
</pallas_src>

<mosaic_0001>
module attributes {stable_mosaic.version = 11 : i64} {
  func.func @kernel(%arg0: i32, %arg1: i32, %arg2: memref<1x18x18x4xf32, #tpu.memory_space<vmem>>, %arg3: memref<9x4x128xf32, #tpu.memory_space<vmem>>, %arg4: memref<1x128x128xf32, #tpu.memory_space<vmem>>) attributes {dimension_semantics = [#tpu.dimension_semantics<parallel>, #tpu.dimension_semantics<parallel>], iteration_bounds = array<i64: 2, 2>, scalar_prefetch = 0 : i64, scratch_operands = 0 : i64, tpu.core_type = #tpu.core_type<tc>, window_params = [{transform_indices = @transform_0, window_bounds = array<i64: 1, 18, 18, 4>}, {pipeline_mode = #tpu.pipeline_mode<synchronous>, transform_indices = @transform_1, window_bounds = array<i64: 9, 4, 128>}, {transform_indices = @transform_2, window_bounds = array<i64: 1, 128, 128>}]} {
    %c8_i32 = arith.constant 8 : i32
    %0 = arith.muli %arg1, %c8_i32 : i32
    %1 = tpu.assume_multiple %0, 8 : i32
    %cst = arith.constant 0.000000e+00 : f32
    %2 = vector.broadcast %cst : f32 to vector<128x128xf32>
    %c0_i32 = arith.constant 0 : i32
    %3 = arith.addi %1, %c0_i32 : i32
    %c0 = arith.constant 0 : index
    %4 = arith.index_cast %3 : i32 to index
    %c0_0 = arith.constant 0 : index
    %c0_1 = arith.constant 0 : index
    %5 = vector.load %arg2[%c0, %4, %c0_0, %c0_1] : memref<1x18x18x4xf32, #tpu.memory_space<vmem>>, vector<1x8x16x4xf32>
    %6 = vector.shape_cast %5 : vector<1x8x16x4xf32> to vector<8x16x4xf32>
    %7 = vector.shape_cast %6 : vector<8x16x4xf32> to vector<128x4xf32>
    %c0_2 = arith.constant 0 : index
    %c0_3 = arith.constant 0 : index
    %c0_4 = arith.constant 0 : index
    %8 = vector.load %arg3[%c0_2, %c0_3, %c0_4] : memref<9x4x128xf32, #tpu.memory_space<vmem>>, vector<1x4x128xf32>
    %9 = vector.shape_cast %8 : vector<1x4x128xf32> to vector<4x128xf32>
    %cst_5 = arith.constant dense<0.000000e+00> : vector<128x128xf32>
    %10 = tpu.matmul %7, %9, %cst_5 {dimension_numbers = #tpu.dot_dimension_numbers<[1], [0], [0], [1], [0, 0, 1, 1], [], []>} : vector<128x4xf32>, vector<4x128xf32>, vector<128x128xf32> -> vector<128x128xf32>
    %11 = arith.addf %2, %10 : vector<128x128xf32>
    %c0_i32_6 = arith.constant 0 : i32
    %12 = arith.addi %1, %c0_i32_6 : i32
    %c0_7 = arith.constant 0 : index
    %13 = arith.index_cast %12 : i32 to index
    %c1 = arith.constant 1 : index
    %c0_8 = arith.constant 0 : index
    %14 = vector.load %arg2[%c0_7, %13, %c1, %c0_8] : memref<1x18x18x4xf32, #tpu.memory_space<vmem>>, vector<1x8x16x4xf32>
    %15 = vector.shape_cast %14 : vector<1x8x16x4xf32> to vector<8x16x4xf32>
    %16 = vector.shape_cast %15 : vector<8x16x4xf32> to vector<128x4xf32>
    %c1_9 = arith.constant 1 : index
    %c0_10 = arith.constant 0 : index
    %c0_11 = arith.constant 0 : index
    %17 = vector.load %arg3[%c1_9, %c0_10, %c0_11] : memref<9x4x128xf32, #tpu.memory_space<vmem>>, vector<1x4x128xf32>
    %18 = vector.shape_cast %17 : vector<1x4x128xf32> to vector<4x128xf32>
    %cst_12 = arith.constant dense<0.000000e+00> : vector<128x128xf32>
    %19 = tpu.matmul %16, %18, %cst_12 {dimension_numbers = #tpu.dot_dimension_numbers<[1], [0], [0], [1], [0, 0, 1, 1], [], []>} : vector<128x4xf32>, vector<4x128xf32>, vector<128x128xf32> -> vector<128x128xf32>
    %20 = arith.addf %11, %19 : vector<128x128xf32>
    %c0_i32_13 = arith.constant 0 : i32
    %21 = arith.addi %1, %c0_i32_13 : i32
    %c0_14 = arith.constant 0 : index
    %22 = arith.index_cast %21 : i32 to index
    %c2 = arith.constant 2 : index
    %c0_15 = arith.constant 0 : index
    %23 = vector.load %arg2[%c0_14, %22, %c2, %c0_15] : memref<1x18x18x4xf32, #tpu.memory_space<vmem>>, vector<1x8x16x4xf32>
    %24 = vector.shape_cast %23 : vector<1x8x16x4xf32> to vector<8x16x4xf32>
    %25 = vector.shape_cast %24 : vector<8x16x4xf32> to vector<128x4xf32>
    %c2_16 = arith.constant 2 : index
    %c0_17 = arith.constant 0 : index
    %c0_18 = arith.constant 0 : index
    %26 = vector.load %arg3[%c2_16, %c0_17, %c0_18] : memref<9x4x128xf32, #tpu.memory_space<vmem>>, vector<1x4x128xf32>
    %27 = vector.shape_cast %26 : vector<1x4x128xf32> to vector<4x128xf32>
    %cst_19 = arith.constant dense<0.000000e+00> : vector<128x128xf32>
    %28 = tpu.matmul %25, %27, %cst_19 {dimension_numbers = #tpu.dot_dimension_numbers<[1], [0], [0], [1], [0, 0, 1, 1], [], []>} : vector<128x4xf32>, vector<4x128xf32>, vector<128x128xf32> -> vector<128x128xf32>
    %29 = arith.addf %20, %28 : vector<128x128xf32>
    %c1_i32 = arith.constant 1 : i32
    %30 = arith.addi %1, %c1_i32 : i32
    %c0_20 = arith.constant 0 : index
    %31 = arith.index_cast %30 : i32 to index
    %c0_21 = arith.constant 0 : index
    %c0_22 = arith.constant 0 : index
    %32 = vector.load %arg2[%c0_20, %31, %c0_21, %c0_22] : memref<1x18x18x4xf32, #tpu.memory_space<vmem>>, vector<1x8x16x4xf32>
    %33 = vector.shape_cast %32 : vector<1x8x16x4xf32> to vector<8x16x4xf32>
    %34 = vector.shape_cast %33 : vector<8x16x4xf32> to vector<128x4xf32>
    %c3 = arith.constant 3 : index
    %c0_23 = arith.constant 0 : index
    %c0_24 = arith.constant 0 : index
    %35 = vector.load %arg3[%c3, %c0_23, %c0_24] : memref<9x4x128xf32, #tpu.memory_space<vmem>>, vector<1x4x128xf32>
    %36 = vector.shape_cast %35 : vector<1x4x128xf32> to vector<4x128xf32>
    %cst_25 = arith.constant dense<0.000000e+00> : vector<128x128xf32>
    %37 = tpu.matmul %34, %36, %cst_25 {dimension_numbers = #tpu.dot_dimension_numbers<[1], [0], [0], [1], [0, 0, 1, 1], [], []>} : vector<128x4xf32>, vector<4x128xf32>, vector<128x128xf32> -> vector<128x128xf32>
    %38 = arith.addf %29, %37 : vector<128x128xf32>
    %c1_i32_26 = arith.constant 1 : i32
    %39 = arith.addi %1, %c1_i32_26 : i32
    %c0_27 = arith.constant 0 : index
    %40 = arith.index_cast %39 : i32 to index
    %c1_28 = arith.constant 1 : index
    %c0_29 = arith.constant 0 : index
    %41 = vector.load %arg2[%c0_27, %40, %c1_28, %c0_29] : memref<1x18x18x4xf32, #tpu.memory_space<vmem>>, vector<1x8x16x4xf32>
    %42 = vector.shape_cast %41 : vector<1x8x16x4xf32> to vector<8x16x4xf32>
    %43 = vector.shape_cast %42 : vector<8x16x4xf32> to vector<128x4xf32>
    %c4 = arith.constant 4 : index
    %c0_30 = arith.constant 0 : index
    %c0_31 = arith.constant 0 : index
    %44 = vector.load %arg3[%c4, %c0_30, %c0_31] : memref<9x4x128xf32, #tpu.memory_space<vmem>>, vector<1x4x128xf32>
    %45 = vector.shape_cast %44 : vector<1x4x128xf32> to vector<4x128xf32>
    %cst_32 = arith.constant dense<0.000000e+00> : vector<128x128xf32>
    %46 = tpu.matmul %43, %45, %cst_32 {dimension_numbers = #tpu.dot_dimension_numbers<[1], [0], [0], [1], [0, 0, 1, 1], [], []>} : vector<128x4xf32>, vector<4x128xf32>, vector<128x128xf32> -> vector<128x128xf32>
    %47 = arith.addf %38, %46 : vector<128x128xf32>
    %c1_i32_33 = arith.constant 1 : i32
    %48 = arith.addi %1, %c1_i32_33 : i32
    %c0_34 = arith.constant 0 : index
    %49 = arith.index_cast %48 : i32 to index
    %c2_35 = arith.constant 2 : index
    %c0_36 = arith.constant 0 : index
    %50 = vector.load %arg2[%c0_34, %49, %c2_35, %c0_36] : memref<1x18x18x4xf32, #tpu.memory_space<vmem>>, vector<1x8x16x4xf32>
    %51 = vector.shape_cast %50 : vector<1x8x16x4xf32> to vector<8x16x4xf32>
    %52 = vector.shape_cast %51 : vector<8x16x4xf32> to vector<128x4xf32>
    %c5 = arith.constant 5 : index
    %c0_37 = arith.constant 0 : index
    %c0_38 = arith.constant 0 : index
    %53 = vector.load %arg3[%c5, %c0_37, %c0_38] : memref<9x4x128xf32, #tpu.memory_space<vmem>>, vector<1x4x128xf32>
    %54 = vector.shape_cast %53 : vector<1x4x128xf32> to vector<4x128xf32>
    %cst_39 = arith.constant dense<0.000000e+00> : vector<128x128xf32>
    %55 = tpu.matmul %52, %54, %cst_39 {dimension_numbers = #tpu.dot_dimension_numbers<[1], [0], [0], [1], [0, 0, 1, 1], [], []>} : vector<128x4xf32>, vector<4x128xf32>, vector<128x128xf32> -> vector<128x128xf32>
    %56 = arith.addf %47, %55 : vector<128x128xf32>
    %c2_i32 = arith.constant 2 : i32
    %57 = arith.addi %1, %c2_i32 : i32
    %c0_40 = arith.constant 0 : index
    %58 = arith.index_cast %57 : i32 to index
    %c0_41 = arith.constant 0 : index
    %c0_42 = arith.constant 0 : index
    %59 = vector.load %arg2[%c0_40, %58, %c0_41, %c0_42] : memref<1x18x18x4xf32, #tpu.memory_space<vmem>>, vector<1x8x16x4xf32>
    %60 = vector.shape_cast %59 : vector<1x8x16x4xf32> to vector<8x16x4xf32>
    %61 = vector.shape_cast %60 : vector<8x16x4xf32> to vector<128x4xf32>
    %c6 = arith.constant 6 : index
    %c0_43 = arith.constant 0 : index
    %c0_44 = arith.constant 0 : index
    %62 = vector.load %arg3[%c6, %c0_43, %c0_44] : memref<9x4x128xf32, #tpu.memory_space<vmem>>, vector<1x4x128xf32>
    %63 = vector.shape_cast %62 : vector<1x4x128xf32> to vector<4x128xf32>
    %cst_45 = arith.constant dense<0.000000e+00> : vector<128x128xf32>
    %64 = tpu.matmul %61, %63, %cst_45 {dimension_numbers = #tpu.dot_dimension_numbers<[1], [0], [0], [1], [0, 0, 1, 1], [], []>} : vector<128x4xf32>, vector<4x128xf32>, vector<128x128xf32> -> vector<128x128xf32>
    %65 = arith.addf %56, %64 : vector<128x128xf32>
    %c2_i32_46 = arith.constant 2 : i32
    %66 = arith.addi %1, %c2_i32_46 : i32
    %c0_47 = arith.constant 0 : index
    %67 = arith.index_cast %66 : i32 to index
    %c1_48 = arith.constant 1 : index
    %c0_49 = arith.constant 0 : index
    %68 = vector.load %arg2[%c0_47, %67, %c1_48, %c0_49] : memref<1x18x18x4xf32, #tpu.memory_space<vmem>>, vector<1x8x16x4xf32>
    %69 = vector.shape_cast %68 : vector<1x8x16x4xf32> to vector<8x16x4xf32>
    %70 = vector.shape_cast %69 : vector<8x16x4xf32> to vector<128x4xf32>
    %c7 = arith.constant 7 : index
    %c0_50 = arith.constant 0 : index
    %c0_51 = arith.constant 0 : index
    %71 = vector.load %arg3[%c7, %c0_50, %c0_51] : memref<9x4x128xf32, #tpu.memory_space<vmem>>, vector<1x4x128xf32>
    %72 = vector.shape_cast %71 : vector<1x4x128xf32> to vector<4x128xf32>
    %cst_52 = arith.constant dense<0.000000e+00> : vector<128x128xf32>
    %73 = tpu.matmul %70, %72, %cst_52 {dimension_numbers = #tpu.dot_dimension_numbers<[1], [0], [0], [1], [0, 0, 1, 1], [], []>} : vector<128x4xf32>, vector<4x128xf32>, vector<128x128xf32> -> vector<128x128xf32>
    %74 = arith.addf %65, %73 : vector<128x128xf32>
    %c2_i32_53 = arith.constant 2 : i32
    %75 = arith.addi %1, %c2_i32_53 : i32
    %c0_54 = arith.constant 0 : index
    %76 = arith.index_cast %75 : i32 to index
    %c2_55 = arith.constant 2 : index
    %c0_56 = arith.constant 0 : index
    %77 = vector.load %arg2[%c0_54, %76, %c2_55, %c0_56] : memref<1x18x18x4xf32, #tpu.memory_space<vmem>>, vector<1x8x16x4xf32>
    %78 = vector.shape_cast %77 : vector<1x8x16x4xf32> to vector<8x16x4xf32>
    %79 = vector.shape_cast %78 : vector<8x16x4xf32> to vector<128x4xf32>
    %c8 = arith.constant 8 : index
    %c0_57 = arith.constant 0 : index
    %c0_58 = arith.constant 0 : index
    %80 = vector.load %arg3[%c8, %c0_57, %c0_58] : memref<9x4x128xf32, #tpu.memory_space<vmem>>, vector<1x4x128xf32>
    %81 = vector.shape_cast %80 : vector<1x4x128xf32> to vector<4x128xf32>
    %cst_59 = arith.constant dense<0.000000e+00> : vector<128x128xf32>
    %82 = tpu.matmul %79, %81, %cst_59 {dimension_numbers = #tpu.dot_dimension_numbers<[1], [0], [0], [1], [0, 0, 1, 1], [], []>} : vector<128x4xf32>, vector<4x128xf32>, vector<128x128xf32> -> vector<128x128xf32>
    %83 = arith.addf %74, %82 : vector<128x128xf32>
    %cst_60 = arith.constant 0.235702261 : f32
    %84 = vector.broadcast %cst_60 : f32 to vector<128x128xf32>
    %85 = arith.mulf %83, %84 : vector<128x128xf32>
    %c0_61 = arith.constant 0 : index
    %c0_62 = arith.constant 0 : index
    %c0_63 = arith.constant 0 : index
    %86 = vector.load %arg4[%c0_61, %c0_62, %c0_63] : memref<1x128x128xf32, #tpu.memory_space<vmem>>, vector<1x128x128xf32>
    %87 = vector.shape_cast %86 : vector<1x128x128xf32> to vector<128x128xf32>
    %88 = vector.shape_cast %85 : vector<128x128xf32> to vector<1x128x128xf32>
    tpu.vector_store %arg4[%c0_61, %c0_62, %c0_63], %88 {strides = array<i32>} : memref<1x128x128xf32, #tpu.memory_space<vmem>>, vector<1x128x128xf32>,
    return
  }
  func.func @transform_0(%arg0: i32, %arg1: i32) -> (i32, i32, i32, i32) {
    %c0_i32 = arith.constant 0 : i32
    %c0_i32_0 = arith.constant 0 : i32
    %c0_i32_1 = arith.constant 0 : i32
    %c0_i32_2 = arith.constant 0 : i32
    return %arg0, %c0_i32, %c0_i32_0, %c0_i32_1 : i32, i32, i32, i32
  }
  func.func @transform_1(%arg0: i32, %arg1: i32) -> (i32, i32, i32) {
    %c0_i32 = arith.constant 0 : i32
    %c0_i32_0 = arith.constant 0 : i32
    %c0_i32_1 = arith.constant 0 : i32
    %c0_i32_2 = arith.constant 0 : i32
    return %c0_i32, %c0_i32_0, %c0_i32_1 : i32, i32, i32
  }
  func.func @transform_2(%arg0: i32, %arg1: i32) -> (i32, i32, i32) {
    %c0_i32 = arith.constant 0 : i32
    %c0_i32_0 = arith.constant 0 : i32
    return %arg0, %arg1, %c0_i32 : i32, i32, i32
  }
}

</mosaic_0001>

<bundles_post_ra>
// kernel: tpu_custom_call.1
= control target key start
LH: loop header
LB: loop body
LE: loop exit
PB: predicated region body
PF: predicated region fallthrough
CT: control target
= control target key end

     0   :  { %7 = vsyncpa [#allocation3], 0  ;;  %s4009_s0 = inlined_call_operand.vmem [shape: f32[2,18,18,4], index: 0, kind: input, shape index: {}]   ;;  %s4010_s1 = inlined_call_operand.vmem [shape: f32[9,4,128], index: 1, kind: input, shape index: {}]   ;;  %s4011_s2 = inlined_call_operand.hbm [shape: f32[2,256,128], index: 2, kind: output, shape index: {}]  }
   0x1   :  { %9 = vsyncpa [#allocation3 + $0x1], 0  ;;  %s3190_s9 = smov 0   ;;  %s3192_s10 = smov 0  }
   0x2   :  { %s3194_s11 = smov 0   ;;  %s3196_s12 = smov 0  }
   0x3   :  { %s3198_s13 = smov 0   ;;  %s3200_s14 = smov 0  }
   0x4   :  { %s3202_s15 = smov 0   ;;  %s3204_s16 = smov 0  }
   0x5 LB: > { %s2339_s17 = sadd.s32 4294967295, %s3170_s16   ;;  %s2340_s18 = sadd.s32 4294967294, %s3170_s16   ;;  %s3170_s16 = sphi %s3204_s16, %s15_s16   ;;  %s3166_s15 = sphi %s3202_s15, %s4058_s15   ;;  %s3162_s14 = sphi %s3200_s14, %s4057_s14   ;;  %s3158_s13 = sphi %s3198_s13, %s4056_s13   ;;  %s3154_s12 = sphi %s3196_s12, %s4055_s12   ;;  %s3150_s11 = sphi %s3194_s11, %s4054_s11   ;;  %s3146_s10 = sphi %s3192_s10, %s4053_s10   ;;  %s3142_s9 = sphi %s3190_s9, %s4052_s9  }
   0x6   : > { %s24_s19 = sadd.s32 1, %s3162_s14  ;;  %s27_s20 = sadd.s32 1, %s3166_s15 }
   0x7   : > { %p25_p0 = scmp.ge.s32.totalorder %s24_s19, 2  ;;  %p93_p1 = scmp.ne.s32.totalorder %s3150_s11, %s3146_s10 }
   0x8   : > { %p94_p2 = scmp.eq.s32.totalorder %s2339_s17, 3  ;;  %p99_p5 = scmp.ne.s32.totalorder %s3146_s10, %s3142_s9 }
   0x9   : > { %s4060_s19 = smov (%p25_p0, %s24_s19), 0  ;;  %s4062_s20 = smov (!%p25_p0, %s27_s20), %s3166_s15 }
   0xa   : > { %s79_s21 = ssub.s32 %s3162_s14, %s4060_s19  ;;  %p3241_p3 = por %p94_p2, %p93_p1 }
   0xb   : > { %p29_p4 = scmp.ge.s32.totalorder %s4062_s20, 2  ;;  %p100_p6 = scmp.eq.s32.totalorder %s2340_s18, 3 }
   0xc   : > { %p2343_p7 = scmp.ge.s32.totalorder %s3170_s16, 1  ;;  %p129_p9 = scmp.lt.s32.totalorder %s3170_s16, 5 }
   0xd   : > { %s4064_s20 = smov (%p29_p4, %s4062_s20), 0  ;;  %p3250_p8 = por %p100_p6, %p99_p5 }
   0xe   : > { %s78_s24 = ssub.s32 %s3166_s15, %s4064_s20  ;;  %s83_s25 = sadd.s32 1, %s3150_s11 }
   0xf   : > { %s80_s26 = sor.u32 %s79_s21, %s78_s24  ;;  %p130_p10 = pnand %p2343_p7, %p129_p9 }
  0x10   : > { %p81_p11 = scmp.eq.s32.totalorder %s80_s26, 0 }
  0x11   : > { %133 = sbr.rel (%p130_p10) target bundleno = 388 (0x184), region = 28 }
  0x12   : > { %s3259_s27 = scalar_select %p81_p11, %s3150_s11, %s83_s25  }
  0x16   : > { %v2348_v0 = vld [vmem:[%s4010_s1 + $0x4] sm:$0xf]  ;;  %vm244_vm0 = vcmask 1043456   ;;  %p151_p12 = scmp.lt.s32.totalorder %s3158_s13, 1  ;;  %v176_v1 = vld [vmem:[%s4010_s1] sm:$0xf] }
  0x17   : > { %3002 = vmatprep.subr.msk.mxu1 %vm244_vm0, %v2348_v0  ;;  %2768 = vmatprep.subr.msk.mxu0 %vm244_vm0, %v2348_v0  ;;  %v2383_v2 = vld [vmem:[%s4010_s1 + $0x8] sm:$0xf]  ;;  %s2347_s7 = smul.u32 192, %s3154_s12  ;;  %vm195_vm1 = vcmask 31744   ;;  %v2419_v9 = vld [vmem:[%s4010_s1 + $0xc] sm:$0xf] }
  0x18   : > { %3003 = vmatpush3.msk.msra.mxu1 %vm244_vm0, %v2348_v0  ;;  %2769 = vmatpush3.msk.msra.mxu0 %vm244_vm0, %v2348_v0  ;;  %s152_s6 = scalar_select %p151_p12, %s3158_s13, 1  ;;  %v2453_v10 = vld [vmem:[%s4010_s1 + $0x10] sm:$0xf]  ;;  %v3385_v27 = vld [vmem:[%s4010_s1 + $0x14] sm:$0xf] }
  0x19   : > { %2794 = vmatprep.subr.msk.mxu1 %vm244_vm0, %v176_v1  ;;  %2820 = vmatprep.subr.msk.mxu0 %vm244_vm0, %v2383_v2  ;;  %v3390_v28 = vld [vmem:[%s4010_s1 + $0x18] sm:$0xf]  ;;  %v2557_v55 = vld [vmem:[%s4010_s1 + $0x1c] sm:$0xf]  ;;  %v2591_v56 = vld [vmem:[%s4010_s1 + $0x20] sm:$0xf] }
  0x1a   : > { %s3004_s8 = smul.u32 432, %s152_s6  ;;  %s148_s18 = sand.u32 1, %s3146_s10  }
  0x1b   : > { %s2610_s25 = sshll.u32 %s3154_s12, 4  ;;  %s2611_s26 = sshll.u32 %s3158_s13, 5 }
  0x1c   : > { %s155_s21 = scalar_lea.vmem %s4009_s0, %s3004_s8  ;;  %s2250_s28 = sadd.s32 %s2611_s26, %s2610_s25 }
  0x1d   : > { %s3282_s24 = scalar_lea.vmem %s155_s21, %s2347_s7  ;;  %s2344_s21 = sshll.u32 %s148_s18, 7 }
  0x1e   : > { %v177_v3 = vld [vmem:[%s3282_s24 + $0x1] sm:$0xff]  ;;  %v178_v5 = vld [vmem:[%s3282_s24 + $0x9] sm:$0xff]  ;;  %v3296_v7 = vld [vmem:[%s3282_s24 + $0x19] sm:$0xff]  ;;  %s2612_s12 = sshll.u32 %s2250_s28, 7  ;;  %s3958_s4 = scalar_lea.sflag [#allocation3], %s148_s18 }
  0x1f   : > { %v3286_v4 = vld [vmem:[%s3282_s24 + $0x61] sm:$0xff]  ;;  %2770 = vmatprep.mubr.msk.f32.mxu0 %vm195_vm1, %v177_v3  ;;  %v3293_v6 = vld [vmem:[%s3282_s24 + $0x69] sm:$0xff]  ;;  %v3299_v8 = vld [vmem:[%s3282_s24 + $0x79] sm:$0xff]  ;;  %s3950_s3 = scalar_lea.hbm %s4011_s2, %s2612_s12  ;;  %s3172_s6 = smov [#allocation2]  }
  0x20   : > { %2782 = vmatprep.mubr.msk.f32.mxu1 %vm195_vm1, %v3286_v4  ;;  %2771 = vmatmul.mubr.msk.f32.vlgmr.msra.gmra.mxu0 %vm195_vm1, %v178_v5  ;;  %v3313_v11 = vld [vmem:[%s3282_s24 + $0x21] sm:$0xff]  ;;  %v3323_v13 = vld [vmem:[%s3282_s24 + $0x31] sm:$0xff]  ;;  %v3339_v15 = vld [vmem:[%s3282_s24 + $0x39] sm:$0xff]  ;;  %s3082_s7 = sshll.u32 %s3172_s6, 4  ;;  %s3083_s7 = int_to_ptr.vmem [resolvable:$false] %s3082_s7 }
  0x21   : > { %2783 = vmatmul.mubr.msk.f32.vlgmr.msra.gmra.mxu1 %vm195_vm1, %v3293_v6  ;;  %2821 = vmatpush3.msk.msra.mxu0 %vm244_vm0, %v2383_v2  ;;  %v3316_v12 = vld [vmem:[%s3282_s24 + $0x81] sm:$0xff]  ;;  %v3326_v14 = vld [vmem:[%s3282_s24 + $0x91] sm:$0xff]  ;;  %v3342_v16 = vld [vmem:[%s3282_s24 + $0x99] sm:$0xff]  ;;  %s3084_s8 = scalar_lea.vmem %s3083_s7, 4096 }
  0x22   : > { %2795 = vmatpush3.msk.msra.mxu1 %vm244_vm0, %v176_v1  ;;  %2773 = vmatprep.mubr.msk.f32.mxu0 %vm195_vm1, %v3296_v7  ;;  %v3345_v17 = vld [vmem:[%s3282_s24 + $0x49] sm:$0xff]  ;;  %v3359_v19 = vld [vmem:[%s3282_s24 + $0x51] sm:$0xff]  ;;  %v160_v21 = vld [vmem:[%s3282_s24] sm:$0xff] }
  0x23   : > { %2785 = vmatprep.mubr.msk.f32.mxu1 %vm195_vm1, %v3299_v8  ;;  %2846 = vmatprep.subr.msk.mxu1 %vm244_vm0, %v2419_v9  ;;  %v3348_v18 = vld [vmem:[%s3282_s24 + $0xa9] sm:$0xff]  ;;  %v3362_v20 = vld [vmem:[%s3282_s24 + $0xb1] sm:$0xff]  ;;  %v3378_v26 = vld [vmem:[%s3282_s24 + $0x1a] sm:$0xff] }
  0x24   : > { %2872 = vmatprep.subr.msk.mxu0 %vm244_vm0, %v2453_v10  ;;  %2774 = vmatmul.mubr.msk.f32.gmra.mxu0 %vm195_vm1, %v3313_v11  ;;  %v589_v22 = vld [vmem:[%s3282_s24 + $0x2] sm:$0xff]  ;;  %v590_v24 = vld [vmem:[%s3282_s24 + $0xa] sm:$0xff]  ;;  %v3375_v25 = vld [vmem:[%s3282_s24 + $0x18] sm:$0xff] }
  0x25   : > { %2786 = vmatmul.mubr.msk.f32.gmra.mxu1 %vm195_vm1, %v3316_v12  ;;  %2776 = vmatprep.mubr.msk.f32.mxu0 %vm195_vm1, %v3323_v13  ;;  %v161_v23 = vld [vmem:[%s3282_s24 + $0x8] sm:$0xff]  ;;  %v163_v29 = vld [vmem:[%s3282_s24 + $0x20] sm:$0xff]  ;;  %v3403_v31 = vld [vmem:[%s3282_s24 + $0x30] sm:$0xff] }
  0x26   : > { %2788 = vmatprep.mubr.msk.f32.mxu1 %vm195_vm1, %v3326_v14  ;;  %v3396_v30 = vld [vmem:[%s3282_s24 + $0x22] sm:$0xff]  ;;  %v3406_v32 = vld [vmem:[%s3282_s24 + $0x32] sm:$0xff]  ;;  %v3423_v34 = vld [vmem:[%s3282_s24 + $0x3a] sm:$0xff] }
  0x27   : > { %v3420_v33 = vld [vmem:[%s3282_s24 + $0x38] sm:$0xff]  ;;  %v3426_v35 = vld [vmem:[%s3282_s24 + $0x48] sm:$0xff]  ;;  %v3440_v37 = vld [vmem:[%s3282_s24 + $0x50] sm:$0xff] }
  0x28   : > { %2777 = vmatmul.mubr.msk.f32.gmra.mxu0 %vm195_vm1, %v3339_v15  ;;  %v3429_v36 = vld [vmem:[%s3282_s24 + $0x4a] sm:$0xff]  ;;  %v3443_v38 = vld [vmem:[%s3282_s24 + $0x52] sm:$0xff]  ;;  %v3446_v39 = vld [vmem:[%s3282_s24 + $0x60] sm:$0xff] }
  0x29   : > { %2789 = vmatmul.mubr.msk.f32.gmra.mxu1 %vm195_vm1, %v3342_v16  ;;  %2779 = vmatprep.mubr.msk.f32.mxu0 %vm195_vm1, %v3345_v17  ;;  %v3449_v40 = vld [vmem:[%s3282_s24 + $0x62] sm:$0xff]  ;;  %v3463_v42 = vld [vmem:[%s3282_s24 + $0x6a] sm:$0xff]  ;;  %v3466_v43 = vld [vmem:[%s3282_s24 + $0x78] sm:$0xff] }
  0x2a   : > { %2791 = vmatprep.mubr.msk.f32.mxu1 %vm195_vm1, %v3348_v18  ;;  %v3460_v41 = vld [vmem:[%s3282_s24 + $0x68] sm:$0xff]  ;;  %v3469_v44 = vld [vmem:[%s3282_s24 + $0x7a] sm:$0xff]  ;;  %v3486_v47 = vld [vmem:[%s3282_s24 + $0x90] sm:$0xff] }
  0x2b   : > { %v3480_v45 = vld [vmem:[%s3282_s24 + $0x80] sm:$0xff]  ;;  %v3489_v48 = vld [vmem:[%s3282_s24 + $0x92] sm:$0xff]  ;;  %v3506_v51 = vld [vmem:[%s3282_s24 + $0xa8] sm:$0xff] }
  0x2c   : > { %2780 = vmatmul.mubr.msk.f32.gmra.mxu0 %vm195_vm1, %v3359_v19  ;;  %v3483_v46 = vld [vmem:[%s3282_s24 + $0x82] sm:$0xff]  ;;  %v3500_v49 = vld [vmem:[%s3282_s24 + $0x98] sm:$0xff]  ;;  %v3509_v52 = vld [vmem:[%s3282_s24 + $0xaa] sm:$0xff] }
  0x2d   : > { %2792 = vmatmul.mubr.msk.f32.gmra.mxu1 %vm195_vm1, %v3362_v20  ;;  %2822 = vmatprep.mubr.msk.f32.mxu0 %vm195_vm1, %v589_v22  ;;  %v3503_v50 = vld [vmem:[%s3282_s24 + $0x9a] sm:$0xff]  ;;  %v3520_v53 = vld [vmem:[%s3282_s24 + $0xb0] sm:$0xff]  ;;  %v2418_v59 = vld [vmem:[%s3282_s24 + $0xc8] sm:$0xff] }
  0x2e   : > { %2796 = vmatprep.mubr.msk.f32.mxu1 %vm195_vm1, %v160_v21  ;;  %v3523_v54 = vld [vmem:[%s3282_s24 + $0xb2] sm:$0xff]  ;;  %v2417_v57 = vld [vmem:[%s3282_s24 + $0xc0] sm:$0xff]  ;;  %v3605_v60 = vld [vmem:[%s3282_s24 + $0xc9] sm:$0xff] }
  0x2f   : > { %v3594_v58 = vld [vmem:[%s3282_s24 + $0xc1] sm:$0xff]  ;;  %v2521_v62 = vld [vmem:[%s3282_s24 + $0xd8] sm:$0xff]  ;;  %v2486_v63 = vld [vmem:[%s3282_s24 + $0xca] sm:$0xff] }
  0x30   : > { %2823 = vmatmul.mubr.msk.f32.vlgmr.msra.gmra.mxu0 %vm195_vm1, %v590_v24  ;;  %v2485_v61 = vld [vmem:[%s3282_s24 + $0xc2] sm:$0xff]  ;;  %v2555_v1 = vld [vmem:[%s3282_s24 + $0xd9] sm:$0xff] }
  0x31   : > { %2797 = vmatmul.mubr.msk.f32.vlgmr.msra.gmra.mxu1 %vm195_vm1, %v161_v23  ;;  %2873 = vmatpush3.msk.msra.mxu0 %vm244_vm0, %v2453_v10  ;;  %v2522_v0 = vld [vmem:[%s3282_s24 + $0xe0] sm:$0xff] }
  0x32   : > { %2847 = vmatpush3.msk.msra.mxu1 %vm244_vm0, %v2419_v9  ;;  %2799 = vmatprep.mubr.msk.f32.mxu1 %vm195_vm1, %v3375_v25  ;;  %v2589_v2 = vld [vmem:[%s3282_s24 + $0xda] sm:$0xff] }
  0x33   : > { %2825 = vmatprep.mubr.msk.f32.mxu0 %vm195_vm1, %v3378_v26  ;;  %2898 = vmatprep.subr.msk.mxu1 %vm244_vm0, %v3385_v27  ;;  %v2556_v3 = vld [vmem:[%s3282_s24 + $0xe1] sm:$0xff] }
  0x34   : > { %2924 = vmatprep.subr.msk.mxu0 %vm244_vm0, %v3390_v28  ;;  %2826 = vmatmul.mubr.msk.f32.gmra.mxu0 %vm195_vm1, %v3396_v30 }
  0x35   : > { %2800 = vmatmul.mubr.msk.f32.gmra.mxu1 %vm195_vm1, %v163_v29  ;;  %2828 = vmatprep.mubr.msk.f32.mxu0 %vm195_vm1, %v3406_v32 }
  0x36   : > { %2802 = vmatprep.mubr.msk.f32.mxu1 %vm195_vm1, %v3403_v31 }
  0x38   : > { %2829 = vmatmul.mubr.msk.f32.gmra.mxu0 %vm195_vm1, %v3423_v34 }
  0x39   : > { %2803 = vmatmul.mubr.msk.f32.gmra.mxu1 %vm195_vm1, %v3420_v33  ;;  %2831 = vmatprep.mubr.msk.f32.mxu0 %vm195_vm1, %v3429_v36 }
  0x3a   : > { %2805 = vmatprep.mubr.msk.f32.mxu1 %vm195_vm1, %v3426_v35 }
  0x3c   : > { %2832 = vmatmul.mubr.msk.f32.gmra.mxu0 %vm195_vm1, %v3443_v38 }
  0x3d   : > { %2806 = vmatmul.mubr.msk.f32.gmra.mxu1 %vm195_vm1, %v3440_v37  ;;  %2834 = vmatprep.mubr.msk.f32.mxu0 %vm195_vm1, %v3449_v40 }
  0x3e   : > { %2808 = vmatprep.mubr.msk.f32.mxu1 %vm195_vm1, %v3446_v39 }
  0x40   : > { %2835 = vmatmul.mubr.msk.f32.gmra.mxu0 %vm195_vm1, %v3463_v42 }
  0x41   : > { %2809 = vmatmul.mubr.msk.f32.gmra.mxu1 %vm195_vm1, %v3460_v41  ;;  %2837 = vmatprep.mubr.msk.f32.mxu0 %vm195_vm1, %v3469_v44 }
  0x42   : > { %2811 = vmatprep.mubr.msk.f32.mxu1 %vm195_vm1, %v3466_v43 }
  0x44   : > { %2838 = vmatmul.mubr.msk.f32.gmra.mxu0 %vm195_vm1, %v3483_v46 }
  0x45   : > { %2812 = vmatmul.mubr.msk.f32.gmra.mxu1 %vm195_vm1, %v3480_v45  ;;  %2840 = vmatprep.mubr.msk.f32.mxu0 %vm195_vm1, %v3489_v48 }
  0x46   : > { %2814 = vmatprep.mubr.msk.f32.mxu1 %vm195_vm1, %v3486_v47 }
  0x48   : > { %2841 = vmatmul.mubr.msk.f32.gmra.mxu0 %vm195_vm1, %v3503_v50 }
  0x49   : > { %2815 = vmatmul.mubr.msk.f32.gmra.mxu1 %vm195_vm1, %v3500_v49  ;;  %2843 = vmatprep.mubr.msk.f32.mxu0 %vm195_vm1, %v3509_v52 }
  0x4a   : > { %2817 = vmatprep.mubr.msk.f32.mxu1 %vm195_vm1, %v3506_v51 }
  0x4c   : > { %2844 = vmatmul.mubr.msk.f32.gmra.mxu0 %vm195_vm1, %v3523_v54 }
  0x4d   : > { %2818 = vmatmul.mubr.msk.f32.gmra.mxu1 %vm195_vm1, %v3520_v53  ;;  %2874 = vmatprep.mubr.msk.f32.mxu0 %vm195_vm1, %v3296_v7 }
  0x4e   : > { %2848 = vmatprep.mubr.msk.f32.mxu1 %vm195_vm1, %v3375_v25 }
  0x50   : > { %2875 = vmatmul.mubr.msk.f32.vlgmr.msra.gmra.mxu0 %vm195_vm1, %v3313_v11 }
  0x51   : > { %2849 = vmatmul.mubr.msk.f32.vlgmr.msra.gmra.mxu1 %vm195_vm1, %v163_v29  ;;  %2925 = vmatpush3.msk.msra.mxu0 %vm244_vm0, %v3390_v28 }
  0x52   : > { %2899 = vmatpush3.msk.msra.mxu1 %vm244_vm0, %v3385_v27  ;;  %2851 = vmatprep.mubr.msk.f32.mxu1 %vm195_vm1, %v3403_v31 }
  0x53   : > { %2877 = vmatprep.mubr.msk.f32.mxu0 %vm195_vm1, %v3323_v13  ;;  %2950 = vmatprep.subr.msk.mxu1 %vm244_vm0, %v2557_v55 }
  0x54   : > { %2976 = vmatprep.subr.msk.mxu0 %vm244_vm0, %v2591_v56  ;;  %2878 = vmatmul.mubr.msk.f32.gmra.mxu0 %vm195_vm1, %v3339_v15 }
  0x55   : > { %2852 = vmatmul.mubr.msk.f32.gmra.mxu1 %vm195_vm1, %v3420_v33  ;;  %2880 = vmatprep.mubr.msk.f32.mxu0 %vm195_vm1, %v3345_v17 }
  0x56   : > { %2854 = vmatprep.mubr.msk.f32.mxu1 %vm195_vm1, %v3426_v35 }
  0x58   : > { %2881 = vmatmul.mubr.msk.f32.gmra.mxu0 %vm195_vm1, %v3359_v19 }
  0x59   : > { %2855 = vmatmul.mubr.msk.f32.gmra.mxu1 %vm195_vm1, %v3440_v37  ;;  %2883 = vmatprep.mubr.msk.f32.mxu0 %vm195_vm1, %v3286_v4 }
  0x5a   : > { %2857 = vmatprep.mubr.msk.f32.mxu1 %vm195_vm1, %v3446_v39 }
  0x5c   : > { %2884 = vmatmul.mubr.msk.f32.gmra.mxu0 %vm195_vm1, %v3293_v6 }
  0x5d   : > { %2858 = vmatmul.mubr.msk.f32.gmra.mxu1 %vm195_vm1, %v3460_v41  ;;  %2886 = vmatprep.mubr.msk.f32.mxu0 %vm195_vm1, %v3299_v8 }
  0x5e   : > { %2860 = vmatprep.mubr.msk.f32.mxu1 %vm195_vm1, %v3466_v43 }
  0x60   : > { %2887 = vmatmul.mubr.msk.f32.gmra.mxu0 %vm195_vm1, %v3316_v12 }
  0x61   : > { %2861 = vmatmul.mubr.msk.f32.gmra.mxu1 %vm195_vm1, %v3480_v45  ;;  %2889 = vmatprep.mubr.msk.f32.mxu0 %vm195_vm1, %v3326_v14 }
  0x62   : > { %2863 = vmatprep.mubr.msk.f32.mxu1 %vm195_vm1, %v3486_v47 }
  0x64   : > { %2890 = vmatmul.mubr.msk.f32.gmra.mxu0 %vm195_vm1, %v3342_v16 }
  0x65   : > { %2864 = vmatmul.mubr.msk.f32.gmra.mxu1 %vm195_vm1, %v3500_v49  ;;  %2892 = vmatprep.mubr.msk.f32.mxu0 %vm195_vm1, %v3348_v18 }
  0x66   : > { %2866 = vmatprep.mubr.msk.f32.mxu1 %vm195_vm1, %v3506_v51 }
  0x68   : > { %2893 = vmatmul.mubr.msk.f32.gmra.mxu0 %vm195_vm1, %v3362_v20 }
  0x69   : > { %2867 = vmatmul.mubr.msk.f32.gmra.mxu1 %vm195_vm1, %v3520_v53  ;;  %2895 = vmatprep.mubr.msk.f32.mxu0 %vm195_vm1, %v3594_v58 }
  0x6a   : > { %2869 = vmatprep.mubr.msk.f32.mxu1 %vm195_vm1, %v2417_v57 }
  0x6c   : > { %2896 = vmatmul.mubr.msk.f32.gmra.mxu0 %vm195_vm1, %v3605_v60 }
  0x6d   : > { %2870 = vmatmul.mubr.msk.f32.gmra.mxu1 %vm195_vm1, %v2418_v59  ;;  %2926 = vmatprep.mubr.msk.f32.mxu0 %vm195_vm1, %v3403_v31 }
  0x6e   : > { %2900 = vmatprep.mubr.msk.f32.mxu1 %vm195_vm1, %v3378_v26 }
  0x70   : > { %2927 = vmatmul.mubr.msk.f32.vlgmr.msra.gmra.mxu0 %vm195_vm1, %v3420_v33 }
  0x71   : > { %2901 = vmatmul.mubr.msk.f32.vlgmr.msra.gmra.mxu1 %vm195_vm1, %v3396_v30  ;;  %2977 = vmatpush3.msk.msra.mxu0 %vm244_vm0, %v2591_v56 }
  0x72   : > { %2951 = vmatpush3.msk.msra.mxu1 %vm244_vm0, %v2557_v55  ;;  %2903 = vmatprep.mubr.msk.f32.mxu1 %vm195_vm1, %v3406_v32 }
  0x73   : > { %2929 = vmatprep.mubr.msk.f32.mxu0 %vm195_vm1, %v3426_v35 }
  0x74   : > { %2930 = vmatmul.mubr.msk.f32.gmra.mxu0 %vm195_vm1, %v3440_v37 }
  0x75   : > { %2904 = vmatmul.mubr.msk.f32.gmra.mxu1 %vm195_vm1, %v3423_v34  ;;  %2932 = vmatprep.mubr.msk.f32.mxu0 %vm195_vm1, %v3446_v39 }
  0x76   : > { %2906 = vmatprep.mubr.msk.f32.mxu1 %vm195_vm1, %v3429_v36 }
  0x78   : > { %2933 = vmatmul.mubr.msk.f32.gmra.mxu0 %vm195_vm1, %v3460_v41 }
  0x79   : > { %2907 = vmatmul.mubr.msk.f32.gmra.mxu1 %vm195_vm1, %v3443_v38  ;;  %2935 = vmatprep.mubr.msk.f32.mxu0 %vm195_vm1, %v3466_v43 }
  0x7a   : > { %2909 = vmatprep.mubr.msk.f32.mxu1 %vm195_vm1, %v3449_v40 }
  0x7c   : > { %2936 = vmatmul.mubr.msk.f32.gmra.mxu0 %vm195_vm1, %v3480_v45 }
  0x7d   : > { %2910 = vmatmul.mubr.msk.f32.gmra.mxu1 %vm195_vm1, %v3463_v42  ;;  %2938 = vmatprep.mubr.msk.f32.mxu0 %vm195_vm1, %v3486_v47 }
  0x7e   : > { %2912 = vmatprep.mubr.msk.f32.mxu1 %vm195_vm1, %v3469_v44 }
  0x80   : > { %2939 = vmatmul.mubr.msk.f32.gmra.mxu0 %vm195_vm1, %v3500_v49 }
  0x81   : > { %2913 = vmatmul.mubr.msk.f32.gmra.mxu1 %vm195_vm1, %v3483_v46  ;;  %2941 = vmatprep.mubr.msk.f32.mxu0 %vm195_vm1, %v3506_v51 }
  0x82   : > { %2915 = vmatprep.mubr.msk.f32.mxu1 %vm195_vm1, %v3489_v48 }
  0x84   : > { %2942 = vmatmul.mubr.msk.f32.gmra.mxu0 %vm195_vm1, %v3520_v53 }
  0x85   : > { %2916 = vmatmul.mubr.msk.f32.gmra.mxu1 %vm195_vm1, %v3503_v50  ;;  %2944 = vmatprep.mubr.msk.f32.mxu0 %vm195_vm1, %v2417_v57 }
  0x86   : > { %2918 = vmatprep.mubr.msk.f32.mxu1 %vm195_vm1, %v3509_v52 }
  0x88   : > { %2945 = vmatmul.mubr.msk.f32.gmra.mxu0 %vm195_vm1, %v2418_v59 }
  0x89   : > { %2919 = vmatmul.mubr.msk.f32.gmra.mxu1 %vm195_vm1, %v3523_v54  ;;  %2947 = vmatprep.mubr.msk.f32.mxu0 %vm195_vm1, %v2521_v62 }
  0x8a   : > { %2921 = vmatprep.mubr.msk.f32.mxu1 %vm195_vm1, %v2485_v61 }
  0x8c   : > { %2948 = vmatmul.mubr.msk.f32.gmra.mxu0 %vm195_vm1, %v2522_v0 }
  0x8d   : > { %2922 = vmatmul.mubr.msk.f32.gmra.mxu1 %vm195_vm1, %v2486_v63  ;;  %2978 = vmatprep.mubr.msk.f32.mxu0 %vm195_vm1, %v3406_v32 }
  0x8e   : > { %2952 = vmatprep.mubr.msk.f32.mxu1 %vm195_vm1, %v3323_v13 }
  0x90   : > { %2979 = vmatmul.mubr.msk.f32.vlgmr.msra.gmra.mxu0 %vm195_vm1, %v3423_v34 }
  0x91   : > { %2953 = vmatmul.mubr.msk.f32.vlgmr.msra.gmra.mxu1 %vm195_vm1, %v3339_v15  ;;  %2981 = vmatprep.mubr.msk.f32.mxu0 %vm195_vm1, %v3429_v36 }
  0x92   : > { %2955 = vmatprep.mubr.msk.f32.mxu1 %vm195_vm1, %v3345_v17 }
  0x94   : > { %2982 = vmatmul.mubr.msk.f32.gmra.mxu0 %vm195_vm1, %v3443_v38 }
  0x95   : > { %2956 = vmatmul.mubr.msk.f32.gmra.mxu1 %vm195_vm1, %v3359_v19  ;;  %2984 = vmatprep.mubr.msk.f32.mxu0 %vm195_vm1, %v3449_v40 }
  0x96   : > { %2958 = vmatprep.mubr.msk.f32.mxu1 %vm195_vm1, %v3286_v4  ;;  %v2590_v4 = vld [vmem:[%s3282_s24 + $0xe2] sm:$0xff]  ;;  %s3888_s24 = scalar_lea.vmem [#allocation2], %s2344_s21 }
  0x97   : > { %s2253_s13 = sshll.u32 %s3888_s24, 4  ;;  %s3952_s13 = int_to_ptr.vmem [resolvable:$true] %s2253_s13 }
  0x98   : > { %2985 = vmatmul.mubr.msk.f32.gmra.mxu0 %vm195_vm1, %v3463_v42  ;;  %s3078_s5 = scalar_lea.vmem %s3952_s13, 2048  ;;  %p3085_p2 = scmp.lt.s32.totalorder %s3952_s13, %s3083_s7 }
  0x99   : > { %2959 = vmatmul.mubr.msk.f32.gmra.mxu1 %vm195_vm1, %v3293_v6  ;;  %2987 = vmatprep.mubr.msk.f32.mxu0 %vm195_vm1, %v3469_v44  ;;  %p3079_p13 = scmp.ne.s32.totalorder %s3952_s13, %s3078_s5  ;;  %p3086_p4 = scmp.lt.s32.totalorder %s3084_s8, %s3078_s5 }
  0x9a   : > { %2961 = vmatprep.mubr.msk.f32.mxu1 %vm195_vm1, %v3299_v8 }
  0x9b   : > { %p3080_p0 = pnand %p3079_p13, %p3241_p3  ;;  %p3087_p5 = por %p3086_p4, %p3085_p2 }
  0x9c   : > { %2988 = vmatmul.mubr.msk.f32.gmra.mxu0 %vm195_vm1, %v3483_v46 }
  0x9d   : > { %2962 = vmatmul.mubr.msk.f32.gmra.mxu1 %vm195_vm1, %v3316_v12  ;;  %2990 = vmatprep.mubr.msk.f32.mxu0 %vm195_vm1, %v3489_v48  ;;  %p3081_p1 = pneg %p3080_p0 }
  0x9e   : > { %2964 = vmatprep.mubr.msk.f32.mxu1 %vm195_vm1, %v3326_v14 }
  0x9f   : > { %p3088_p6 = pnand %p3087_p5, %p3081_p1 }
  0xa0   : > { %2991 = vmatmul.mubr.msk.f32.gmra.mxu0 %vm195_vm1, %v3503_v50 }
  0xa1   : > { %2965 = vmatmul.mubr.msk.f32.gmra.mxu1 %vm195_vm1, %v3342_v16  ;;  %2993 = vmatprep.mubr.msk.f32.mxu0 %vm195_vm1, %v3509_v52 }
  0xa2   : > { %2967 = vmatprep.mubr.msk.f32.mxu1 %vm195_vm1, %v3348_v18 }
  0xa4   : > { %2994 = vmatmul.mubr.msk.f32.gmra.mxu0 %vm195_vm1, %v3523_v54 }
  0xa5   : > { %2968 = vmatmul.mubr.msk.f32.gmra.mxu1 %vm195_vm1, %v3362_v20  ;;  %2996 = vmatprep.mubr.msk.f32.mxu0 %vm195_vm1, %v2485_v61 }
  0xa6   : > { %2970 = vmatprep.mubr.msk.f32.mxu1 %vm195_vm1, %v3594_v58 }
  0xa8   : > { %2997 = vmatmul.mubr.msk.f32.gmra.mxu0 %vm195_vm1, %v2486_v63 }
  0xa9   : > { %2971 = vmatmul.mubr.msk.f32.gmra.mxu1 %vm195_vm1, %v3605_v60  ;;  %2999 = vmatprep.mubr.msk.f32.mxu0 %vm195_vm1, %v2589_v2 }
  0xaa   : > { %2973 = vmatprep.mubr.msk.f32.mxu1 %vm195_vm1, %v2555_v1 }
  0xac   : > { %3000 = vmatmul.mubr.msk.f32.gmra.mxu0 %vm195_vm1, %v2590_v4 }
  0xad   : > { %2974 = vmatmul.mubr.msk.f32.gmra.mxu1 %vm195_vm1, %v2556_v3 }
  0xe0   : > { %v2772_v5 = vpop.f32.mrf.mxu0 }
  0xe1   : > { %v2784_v6 = vpop.f32.mrf.mxu1 }
  0xe2   : > { %v314_v7 = vpop.f32.mrf.mxu0 }
  0xe3   : > { %v354_v8 = vpop.f32.mrf.mxu1 }
  0xe4   : > { %v2775_v9 = vpop.f32.mrf.mxu0 }
  0xe5   : > { %v2787_v10 = vpop.f32.mrf.mxu1 }
  0xe6   : > { %v324_v11 = vpop.f32.mrf.mxu0 }
  0xe7   : > { %v364_v12 = vpop.f32.mrf.mxu1 }
  0xe8   : > { %v2778_v13 = vpop.f32.mrf.mxu0 }
  0xe9   : > { %v2790_v14 = vpop.f32.mrf.mxu1 }
  0xea   : > { %v334_v15 = vpop.f32.mrf.mxu0 }
  0xeb   : > { %v374_v16 = vpop.f32.mrf.mxu1 }
  0xec   : > { %v2781_v17 = vpop.f32.mrf.mxu0 }
  0xed   : > { %v2793_v18 = vpop.f32.mrf.mxu1 }
  0xee   : > { %v344_v19 = vpop.f32.mrf.mxu0 }
  0xef   : > { %v3736_v20 = vpop.f32.mrf.mxu1 }
  0xf0   : > { %v2824_v22 = vpop.f32.mrf.mxu0 }
  0xf1   : > { %v2798_v21 = vpop.f32.mrf.mxu1 }
  0xf2   : > { %v516_v23 = vadd.f32 %v2798_v21, %v2772_v5  ;;  %v724_v25 = vpop.f32.mrf.mxu0 }
  0xf3   : > { %v510_v24 = vpop.f32.mrf.mxu1 }
  0xf4   : > { %v3738_v26 = vadd.f32 %v2824_v22, %v516_v23  ;;  %v511_v27 = vadd.f32 %v510_v24, %v314_v7  ;;  %v2827_v29 = vpop.f32.mrf.mxu0 }
  0xf5   : > { %v2801_v28 = vpop.f32.mrf.mxu1 }
  0xf6   : > { %v3740_v30 = vadd.f32 %v724_v25, %v511_v27  ;;  %v526_v31 = vadd.f32 %v2801_v28, %v2775_v9  ;;  %v734_v33 = vpop.f32.mrf.mxu0 }
  0xf7   : > { %v520_v32 = vpop.f32.mrf.mxu1 }
  0xf8   : > { %v3742_v34 = vadd.f32 %v2827_v29, %v526_v31  ;;  %v521_v35 = vadd.f32 %v520_v32, %v324_v11  ;;  %v2830_v37 = vpop.f32.mrf.mxu0 }
  0xf9   : > { %v2804_v36 = vpop.f32.mrf.mxu1 }
  0xfa   : > { %v3744_v38 = vadd.f32 %v734_v33, %v521_v35  ;;  %v536_v39 = vadd.f32 %v2804_v36, %v2778_v13  ;;  %v744_v41 = vpop.f32.mrf.mxu0 }
  0xfb   : > { %v530_v40 = vpop.f32.mrf.mxu1 }
  0xfc   : > { %v3746_v42 = vadd.f32 %v2830_v37, %v536_v39  ;;  %v531_v43 = vadd.f32 %v530_v40, %v334_v15  ;;  %v2833_v45 = vpop.f32.mrf.mxu0 }
  0xfd   : > { %v2807_v44 = vpop.f32.mrf.mxu1 }
  0xfe   : > { %v3748_v46 = vadd.f32 %v744_v41, %v531_v43  ;;  %v546_v47 = vadd.f32 %v2807_v44, %v2781_v17  ;;  %v754_v49 = vpop.f32.mrf.mxu0 }
  0xff   : > { %v540_v48 = vpop.f32.mrf.mxu1 }
 0x100   : > { %v3750_v50 = vadd.f32 %v2833_v45, %v546_v47  ;;  %v541_v51 = vadd.f32 %v540_v48, %v344_v19  ;;  %v2836_v53 = vpop.f32.mrf.mxu0 }
 0x101   : > { %v2810_v52 = vpop.f32.mrf.mxu1 }
 0x102   : > { %v3752_v54 = vadd.f32 %v754_v49, %v541_v51  ;;  %v556_v55 = vadd.f32 %v2810_v52, %v2784_v6  ;;  %v764_v57 = vpop.f32.mrf.mxu0 }
 0x103   : > { %v550_v56 = vpop.f32.mrf.mxu1 }
 0x104   : > { %v3754_v58 = vadd.f32 %v2836_v53, %v556_v55  ;;  %v551_v59 = vadd.f32 %v550_v56, %v354_v8  ;;  %v2839_v61 = vpop.f32.mrf.mxu0 }
 0x105   : > { %v2813_v60 = vpop.f32.mrf.mxu1 }
 0x106   : > { %v3756_v62 = vadd.f32 %v764_v57, %v551_v59  ;;  %v566_v63 = vadd.f32 %v2813_v60, %v2787_v10  ;;  %v774_v1 = vpop.f32.mrf.mxu0 }
 0x107   : > { %v560_v0 = vpop.f32.mrf.mxu1 }
 0x108   : > { %v3758_v2 = vadd.f32 %v2839_v61, %v566_v63  ;;  %v561_v3 = vadd.f32 %v560_v0, %v364_v12  ;;  %v2842_v5 = vpop.f32.mrf.mxu0 }
 0x109   : > { %v2816_v4 = vpop.f32.mrf.mxu1 }
 0x10a   : > { %v3760_v7 = vadd.f32 %v774_v1, %v561_v3  ;;  %v576_v6 = vadd.f32 %v2816_v4, %v2790_v14  ;;  %v784_v11 = vpop.f32.mrf.mxu0 }
 0x10b   : > { %v570_v9 = vpop.f32.mrf.mxu1 }
 0x10c   : > { %v3762_v13 = vadd.f32 %v2842_v5, %v576_v6  ;;  %v571_v8 = vadd.f32 %v570_v9, %v374_v16  ;;  %v2845_v17 = vpop.f32.mrf.mxu0 }
 0x10d   : > { %v2819_v15 = vpop.f32.mrf.mxu1 }
 0x10e   : > { %v3764_v19 = vadd.f32 %v784_v11, %v571_v8  ;;  %v586_v10 = vadd.f32 %v2819_v15, %v2793_v18  ;;  %v794_v22 = vpop.f32.mrf.mxu0 }
 0x10f   : > { %v580_v21 = vpop.f32.mrf.mxu1 }
 0x110   : > { %4014 = vst [vmem:[#allocation5_spill] sm:$0xff] %v3764_v19  ;;  %v3766_v23 = vadd.f32 %v2845_v17, %v586_v10  ;;  %v581_v12 = vadd.f32 %v580_v21, %v3736_v20  ;;  %v2876_v25 = vpop.f32.mrf.mxu0 }
 0x111   : > { %v2850_v24 = vpop.f32.mrf.mxu1 }
 0x112   : > { %4015 = vst [vmem:[#allocation6_spill] sm:$0xff] %v3766_v23  ;;  %v3769_v27 = vadd.f32 %v794_v22, %v581_v12  ;;  %v1187_v28 = vpop.f32.mrf.mxu0  ;;  %v1037_v23 = vadd.f32 %v2850_v24, %v3738_v26 }
 0x113   : > { %v957_v14 = vpop.f32.mrf.mxu1 }
 0x114   : > { %4016 = vst [vmem:[#allocation7_spill] sm:$0xff] %v3769_v27  ;;  %v3771_v31 = vpop.f32.mrf.mxu0  ;;  %v1036_v19 = vadd.f32 %v957_v14, %v3740_v30 }
 0x115   : > { %v2853_v29 = vpop.f32.mrf.mxu1 }
 0x116   : > { %v3773_v32 = vpop.f32.mrf.mxu0 }
 0x117   : > { %v967_v16 = vpop.f32.mrf.mxu1 }
 0x118   : > { %v3775_v18 = vpop.f32.mrf.mxu0  ;;  %v1038_v26 = vadd.f32 %v967_v16, %v3744_v38 }
 0x119   : > { %v2856_v33 = vpop.f32.mrf.mxu1 }
 0x11a   : > { %v3777_v36 = vpop.f32.mrf.mxu0  ;;  %v1268_v38 = vadd.f32 %v3773_v32, %v1038_v26 }
 0x11b   : > { %v977_v35 = vpop.f32.mrf.mxu1 }
 0x11c   : > { %v3781_v20 = vpop.f32.mrf.mxu0 }
 0x11d   : > { %v3779_v37 = vpop.f32.mrf.mxu1 }
 0x11e   : > { %v3785_v40 = vpop.f32.mrf.mxu0  ;;  %v1043_v16 = vadd.f32 %v3779_v37, %v3750_v50 }
 0x11f   : > { %v3783_v39 = vpop.f32.mrf.mxu1 }
 0x120   : > { %v3789_v43 = vpop.f32.mrf.mxu0  ;;  %v1273_v50 = vadd.f32 %v3781_v20, %v1043_v16 }
 0x121   : > { %v3787_v41 = vpop.f32.mrf.mxu1 }
 0x122   : > { %v3793_v45 = vpop.f32.mrf.mxu0  ;;  %v1045_v37 = vadd.f32 %v3787_v41, %v3754_v58 }
 0x123   : > { %v3791_v44 = vpop.f32.mrf.mxu1 }
 0x124   : > { %v3797_v48 = vpop.f32.mrf.mxu0 }
 0x125   : > { %v3795_v47 = vpop.f32.mrf.mxu1 }
 0x126   : > { %v3801_v51 = vpop.f32.mrf.mxu0 }
 0x127   : > { %v3799_v49 = vpop.f32.mrf.mxu1  ;;  %4017 = vst [vmem:[#allocation8_spill] sm:$0xff] %v3801_v51 }
 0x128   : > { %v3805_v53 = vpop.f32.mrf.mxu0 }
 0x129   : > { %v3803_v52 = vpop.f32.mrf.mxu1  ;;  %4018 = vst [vmem:[#allocation9_spill] sm:$0xff] %v3805_v53 }
 0x12a   : > { %v3809_v56 = vpop.f32.mrf.mxu0 }
 0x12b   : > { %v3807_v55 = vpop.f32.mrf.mxu1  ;;  %4020 = vst [vmem:[#allocation11_spill] sm:$0xff] %v3809_v56 }
 0x12c   : > { %4019 = vst [vmem:[#allocation10_spill] sm:$0xff] %v3807_v55  ;;  %v3813_v59 = vpop.f32.mrf.mxu0 }
 0x12d   : > { %v3811_v57 = vpop.f32.mrf.mxu1  ;;  %4022 = vst [vmem:[#allocation13_spill] sm:$0xff] %v3813_v59 }
 0x12e   : > { %4021 = vst [vmem:[#allocation12_spill] sm:$0xff] %v3811_v57  ;;  %v3817_v61 = vpop.f32.mrf.mxu0 }
 0x12f   : > { %v3815_v60 = vpop.f32.mrf.mxu1  ;;  %4024 = vst [vmem:[#allocation15_spill] sm:$0xff] %v3817_v61 }
 0x130   : > { %4023 = vst [vmem:[#allocation14_spill] sm:$0xff] %v3815_v60  ;;  %v2928_v0 = vpop.f32.mrf.mxu0 }
 0x131   : > { %v2902_v63 = vpop.f32.mrf.mxu1 }
 0x132   : > { %v1650_v3 = vpop.f32.mrf.mxu0 }
 0x133   : > { %v1417_v1 = vpop.f32.mrf.mxu1 }
 0x134   : > { %v2931_v5 = vpop.f32.mrf.mxu0 }
 0x135   : > { %v2905_v4 = vpop.f32.mrf.mxu1 }
 0x136   : > { %v1660_v9 = vpop.f32.mrf.mxu0 }
 0x137   : > { %v1427_v6 = vpop.f32.mrf.mxu1 }
 0x138   : > { %v3819_v8 = vpop.f32.mrf.mxu0 }
 0x139   : > { %v2908_v11 = vpop.f32.mrf.mxu1 }
 0x13a   : > { %v3821_v17 = vpop.f32.mrf.mxu0 }
 0x13b   : > { %v1437_v15 = vpop.f32.mrf.mxu1 }
 0x13c   : > { %v3825_v21 = vpop.f32.mrf.mxu0 }
 0x13d   : > { %v3823_v10 = vpop.f32.mrf.mxu1 }
 0x13e   : > { %v3829_v12 = vpop.f32.mrf.mxu0  ;;  %v1503_v20 = vadd.f32 %v3823_v10, %v1273_v50 }
 0x13f   : > { %v3827_v22 = vpop.f32.mrf.mxu1  ;;  %4025 = vst [vmem:[#allocation16_spill] sm:$0xff] %v3829_v12 }
 0x140   : > { %v3833_v59 = vpop.f32.mrf.mxu0 }
 0x141   : > { %v3831_v61 = vpop.f32.mrf.mxu1  ;;  %4026 = vst [vmem:[#allocation17_spill] sm:$0xff] %v3833_v59  ;;  %v1267_v59 = vadd.f32 %v2876_v25, %v1037_v23 }
 0x142   : > { %v3837_v27 = vpop.f32.mrf.mxu0 }
 0x143   : > { %v3835_v60 = vpop.f32.mrf.mxu1  ;;  %4028 = vst [vmem:[#allocation19_spill] sm:$0xff] %v3837_v27  ;;  %v1039_v27 = vadd.f32 %v2853_v29, %v3742_v34  ;;  %v1497_v24 = vadd.f32 %v2902_v63, %v1267_v59  ;;  %v1040_v34 = vadd.f32 %v977_v35, %v3748_v46  ;;  %v1042_v35 = vadd.f32 %v3783_v39, %v3752_v54 }
 0x144   : > { %4027 = vst [vmem:[#allocation18_spill] sm:$0xff] %v3835_v60  ;;  %v3841_v57 = vpop.f32.mrf.mxu0  ;;  %v1044_v39 = vadd.f32 %v3791_v44, %v3756_v62  ;;  %v1047_v62 = vadd.f32 %v3795_v47, %v3758_v2  ;;  %v1736_v47 = vadd.f32 %v3825_v21, %v1503_v20 }
 0x145   : > { %v3839_v56 = vpop.f32.mrf.mxu1  ;;  %4030 = vst [vmem:[#allocation21_spill] sm:$0xff] %v3841_v57  ;;  %v1266_v57 = vadd.f32 %v1187_v28, %v1036_v19  ;;  %v1269_v14 = vadd.f32 %v3771_v31, %v1039_v27  ;;  %v1730_v19 = vadd.f32 %v2928_v0, %v1497_v24  ;;  %v1270_v46 = vadd.f32 %v3777_v36, %v1040_v34 }
 0x146   : > { %4029 = vst [vmem:[#allocation20_spill] sm:$0xff] %v3839_v56  ;;  %v3846_v55 = vpop.f32.mrf.mxu0  ;;  %v1272_v54 = vadd.f32 %v3785_v40, %v1042_v35 }
 0x147   : > { %v3844_v53 = vpop.f32.mrf.mxu1  ;;  %4032 = vst [vmem:[#allocation23_spill] sm:$0xff] %v3846_v55  ;;  %v1041_v55 = vadd.f32 %v2856_v33, %v3746_v42  ;;  %v1496_v23 = vadd.f32 %v1417_v1, %v1266_v57  ;;  %v1499_v28 = vadd.f32 %v2905_v4, %v1269_v14  ;;  %v1498_v57 = vadd.f32 %v1427_v6, %v1268_v38 }
 0x148   : > { %4031 = vst [vmem:[#allocation22_spill] sm:$0xff] %v3844_v53  ;;  %v3851_v12 = vpop.f32.mrf.mxu0  ;;  %v1502_v10 = vadd.f32 %v3827_v22, %v1272_v54 }
 0x149   : > { %v3849_v51 = vpop.f32.mrf.mxu1  ;;  %v1271_v42 = vadd.f32 %v3775_v18, %v1041_v55  ;;  %v1729_v31 = vadd.f32 %v1650_v3, %v1496_v23  ;;  %v1732_v1 = vadd.f32 %v2931_v5, %v1499_v28  ;;  %v1500_v3 = vadd.f32 %v1437_v15, %v1270_v46 }
 0x14a   : > { %v3856_v56 = vpop.f32.mrf.mxu0  ;;  %v1731_v26 = vadd.f32 %v1660_v9, %v1498_v57  ;;  %v1275_v15 = vadd.f32 %v3789_v43, %v1045_v37  ;;  %v1274_v28 = vadd.f32 %v3793_v45, %v1044_v39  ;;  %v1046_v43 = vadd.f32 %v3799_v49, %v3760_v7  ;;  %v4034_v49 = vld [vmem:[#allocation16_spill] sm:$0xff]  ;;  %v4043_v39 = vld [vmem:[#allocation19_spill] sm:$0xff] }
 0x14b   : > { %v3854_v60 = vpop.f32.mrf.mxu1  ;;  %v1501_v32 = vadd.f32 %v2908_v11, %v1271_v42  ;;  %v1733_v40 = vadd.f32 %v3821_v17, %v1500_v3  ;;  %v1049_v45 = vadd.f32 %v3803_v52, %v3762_v13 }
 0x14c   : > { %v3862_v30 = vpop.f32.mrf.mxu0  ;;  %v1505_v42 = vadd.f32 %v3831_v61, %v1275_v15  ;;  %v1735_v61 = vadd.f32 %v4034_v49, %v1502_v10 }
 0x14d   : > { %v3860_v53 = vpop.f32.mrf.mxu1  ;;  %v1734_v5 = vadd.f32 %v3819_v8, %v1501_v32  ;;  %v4035_v32 = vld [vmem:[#allocation8_spill] sm:$0xff] }
 0x14e   : > { %v3868_v29 = vpop.f32.mrf.mxu0  ;;  %v4039_v52 = vld [vmem:[#allocation20_spill] sm:$0xff] }
 0x14f   : > { %v3866_v25 = vpop.f32.mrf.mxu1  ;;  %v4044_v20 = vld [vmem:[#allocation22_spill] sm:$0xff] }
 0x150   : > { %v2980_v27 = vpop.f32.mrf.mxu0 }
 0x151   : > { %v2954_v33 = vpop.f32.mrf.mxu1 }
 0x152   : > { %v1960_v59 = vadd.f32 %v2954_v33, %v1730_v19  ;;  %v2110_v0 = vpop.f32.mrf.mxu0 }
 0x153   : > { %v1880_v63 = vpop.f32.mrf.mxu1 }
 0x154   : > { %v2190_v18 = vadd.f32 %v2980_v27, %v1960_v59  ;;  %v1959_v55 = vadd.f32 %v1880_v63, %v1729_v31  ;;  %v2983_v6 = vpop.f32.mrf.mxu0  ;;  %v1277_v27 = vadd.f32 %v3797_v48, %v1047_v62  ;;  %v4033_v31 = vld [vmem:[#allocation18_spill] sm:$0xff]  ;;  %v1276_v63 = vadd.f32 %v4035_v32, %v1046_v43  ;;  %v4045_v62 = vld [vmem:[#allocation11_spill] sm:$0xff] }
 0x155   : > { %v2957_v4 = vpop.f32.mrf.mxu1  ;;  %v1504_v57 = vadd.f32 %v4033_v31, %v1274_v28  ;;  %v4048_v28 = vld [vmem:[#allocation21_spill] sm:$0xff] }
 0x156   : > { %v2206_v24 = vmul.f32 0.23570226, %v2190_v18  ;;  %v2189_v36 = vadd.f32 %v2110_v0, %v1959_v55  ;;  %v1962_v14 = vadd.f32 %v2957_v4, %v1732_v1  ;;  %v2120_v23 = vpop.f32.mrf.mxu0  ;;  %v4036_v0 = vld [vmem:[#allocation5_spill] sm:$0xff]  ;;  %v4037_v1 = vld [vmem:[#allocation10_spill] sm:$0xff]  ;;  %v1507_v37 = vadd.f32 %v4039_v52, %v1277_v27 }
 0x157   : > { %v1890_v11 = vpop.f32.mrf.mxu1  ;;  %v1048_v48 = vadd.f32 %v4037_v1, %v4036_v0  ;;  %v4038_v18 = vld [vmem:[#allocation17_spill] sm:$0xff] }
 0x158   : > { %2222 = vst [vmem:[%s3888_s24 + $0x8] sm:$0xff] %v2206_v24  ;;  %v2205_v58 = vmul.f32 0.23570226, %v2189_v36  ;;  %v2192_v41 = vadd.f32 %v2983_v6, %v1962_v14  ;;  %v1961_v9 = vadd.f32 %v1890_v11, %v1731_v26  ;;  %v2986_v8 = vpop.f32.mrf.mxu0  ;;  %v1738_v55 = vadd.f32 %v4038_v18, %v1505_v42  ;;  %v4040_v26 = vld [vmem:[#allocation9_spill] sm:$0xff]  ;;  %v4041_v36 = vld [vmem:[#allocation6_spill] sm:$0xff]  ;;  %v4042_v14 = vld [vmem:[#allocation12_spill] sm:$0xff] }
 0x159   : > { %v2960_v44 = vpop.f32.mrf.mxu1  ;;  %v1279_v24 = vadd.f32 %v4040_v26, %v1049_v45  ;;  %v1051_v54 = vadd.f32 %v4042_v14, %v4041_v36  ;;  %v1740_v43 = vadd.f32 %v4048_v28, %v1507_v37  ;;  %v4050_v45 = vld [vmem:[#allocation23_spill] sm:$0xff] }
 0x15a   : > { %2221 = vst [vmem:[%s3888_s24] sm:$0xff] %v2205_v58  ;;  %v2208_v34 = vmul.f32 0.23570226, %v2192_v41  ;;  %v2191_v38 = vadd.f32 %v2120_v23, %v1961_v9  ;;  %v1964_v19 = vadd.f32 %v2960_v44, %v1734_v5  ;;  %v2130_v2 = vpop.f32.mrf.mxu0  ;;  %v1737_v5 = vadd.f32 %v4043_v39, %v1504_v57  ;;  %v4046_v44 = vld [vmem:[#allocation7_spill] sm:$0xff] }
 0x15b   : > { %v1900_v16 = vpop.f32.mrf.mxu1  ;;  %v1506_v58 = vadd.f32 %v4044_v20, %v1276_v63 }
 0x15c   : > { %2224 = vst [vmem:[%s3888_s24 + $0x18] sm:$0xff] %v2208_v34  ;;  %v2207_v17 = vmul.f32 0.23570226, %v2191_v38  ;;  %v2194_v33 = vadd.f32 %v2986_v8, %v1964_v19  ;;  %v1963_v22 = vadd.f32 %v1900_v16, %v1733_v40  ;;  %v2989_v7 = vpop.f32.mrf.mxu0  ;;  %v1278_v40 = vadd.f32 %v4045_v62, %v1048_v48  ;;  %v4047_v8 = vld [vmem:[#allocation14_spill] sm:$0xff] }
 0x15d   : > { %v2963_v59 = vpop.f32.mrf.mxu1  ;;  %v1050_v10 = vadd.f32 %v4047_v8, %v4046_v44  ;;  %v1509_v34 = vadd.f32 %v3849_v51, %v1279_v24  ;;  %v1739_v31 = vadd.f32 %v4050_v45, %v1506_v58 }
 0x15e   : > { %2223 = vst [vmem:[%s3888_s24 + $0x10] sm:$0xff] %v2207_v17  ;;  %v2210_v46 = vmul.f32 0.23570226, %v2194_v33  ;;  %v2193_v35 = vadd.f32 %v2130_v2, %v1963_v22  ;;  %v1966_v21 = vadd.f32 %v2963_v59, %v1736_v47  ;;  %v2140_v13 = vpop.f32.mrf.mxu0  ;;  %v4049_v47 = vld [vmem:[#allocation13_spill] sm:$0xff]  ;;  %v1508_v33 = vadd.f32 %v3854_v60, %v1278_v40 }
 0x15f   : > { %v1910_v50 = vpop.f32.mrf.mxu1  ;;  %v1281_v17 = vadd.f32 %v4049_v47, %v1051_v54 }
 0x160   : > { %2226 = vst [vmem:[%s3888_s24 + $0x28] sm:$0xff] %v2210_v46  ;;  %v2209_v3 = vmul.f32 0.23570226, %v2193_v35  ;;  %v2196_v4 = vadd.f32 %v2989_v7, %v1966_v21  ;;  %v1965_v6 = vadd.f32 %v1910_v50, %v1735_v61  ;;  %v2992_v23 = vpop.f32.mrf.mxu0  ;;  %v4051_v7 = vld [vmem:[#allocation15_spill] sm:$0xff]  ;;  %v1742_v61 = vadd.f32 %v3851_v12, %v1509_v34 }
 0x161   : > { %v2966_v11 = vpop.f32.mrf.mxu1  ;;  %v1280_v49 = vadd.f32 %v4051_v7, %v1050_v10  ;;  %v1511_v21 = vadd.f32 %v3860_v53, %v1281_v17  ;;  %v1741_v0 = vadd.f32 %v3856_v56, %v1508_v33 }
 0x162   : > { %2225 = vst [vmem:[%s3888_s24 + $0x20] sm:$0xff] %v2209_v3  ;;  %v2212_v41 = vmul.f32 0.23570226, %v2196_v4  ;;  %v2195_v9 = vadd.f32 %v2140_v13, %v1965_v6  ;;  %v1968_v15 = vadd.f32 %v2966_v11, %v1738_v55  ;;  %v2150_v19 = vpop.f32.mrf.mxu0 }
 0x163   : > { %v1920_v38 = vpop.f32.mrf.mxu1  ;;  %v1510_v18 = vadd.f32 %v3866_v25, %v1280_v49  ;;  %v1744_v52 = vadd.f32 %v3862_v30, %v1511_v21 }
 0x164   : > { %2228 = vst [vmem:[%s3888_s24 + $0x38] sm:$0xff] %v2212_v41  ;;  %v2211_v42 = vmul.f32 0.23570226, %v2195_v9  ;;  %v2198_v16 = vadd.f32 %v2992_v23, %v1968_v15  ;;  %v1967_v2 = vadd.f32 %v1920_v38, %v1737_v5  ;;  %v2995_v27 = vpop.f32.mrf.mxu0 }
 0x165   : > { %v2969_v22 = vpop.f32.mrf.mxu1  ;;  %v1743_v6 = vadd.f32 %v3868_v29, %v1510_v18 }
 0x166   : > { %2227 = vst [vmem:[%s3888_s24 + $0x30] sm:$0xff] %v2211_v42  ;;  %v2214_v57 = vmul.f32 0.23570226, %v2198_v16  ;;  %v2197_v51 = vadd.f32 %v2150_v19, %v1967_v2  ;;  %v1970_v59 = vadd.f32 %v2969_v22, %v1740_v43  ;;  %v2160_v35 = vpop.f32.mrf.mxu0 }
 0x167   : > { %v1930_v46 = vpop.f32.mrf.mxu1 }
 0x168   : > { %2230 = vst [vmem:[%s3888_s24 + $0x48] sm:$0xff] %v2214_v57  ;;  %v2213_v60 = vmul.f32 0.23570226, %v2197_v51  ;;  %v2200_v32 = vadd.f32 %v2995_v27, %v1970_v59  ;;  %v1969_v63 = vadd.f32 %v1930_v46, %v1739_v31  ;;  %v2998_v48 = vpop.f32.mrf.mxu0 }
 0x169   : > { %v2972_v1 = vpop.f32.mrf.mxu1 }
 0x16a   : > { %2229 = vst [vmem:[%s3888_s24 + $0x40] sm:$0xff] %v2213_v60  ;;  %v2216_v55 = vmul.f32 0.23570226, %v2200_v32  ;;  %v2199_v12 = vadd.f32 %v2160_v35, %v1969_v63  ;;  %v1972_v50 = vadd.f32 %v2972_v1, %v1742_v61  ;;  %v2170_v53 = vpop.f32.mrf.mxu0 }
 0x16b   : > { %v1940_v13 = vpop.f32.mrf.mxu1 }
 0x16c   : > { %2232 = vst [vmem:[%s3888_s24 + $0x58] sm:$0xff] %v2216_v55  ;;  %v2215_v37 = vmul.f32 0.23570226, %v2199_v12  ;;  %v2202_v3 = vadd.f32 %v2998_v48, %v1972_v50  ;;  %v1971_v56 = vadd.f32 %v1940_v13, %v1741_v0  ;;  %v3001_v25 = vpop.f32.mrf.mxu0 }
 0x16d   : > { %v2975_v4 = vpop.f32.mrf.mxu1 }
 0x16e   : > { %2231 = vst [vmem:[%s3888_s24 + $0x50] sm:$0xff] %v2215_v37  ;;  %v2218_v26 = vmul.f32 0.23570226, %v2202_v3  ;;  %v2201_v24 = vadd.f32 %v2170_v53, %v1971_v56  ;;  %v1974_v36 = vadd.f32 %v2975_v4, %v1744_v52  ;;  %v2180_v5 = vpop.f32.mrf.mxu0 }
 0x16f   : > { %v1950_v14 = vpop.f32.mrf.mxu1 }
 0x170   : > { %2234 = vst [vmem:[%s3888_s24 + $0x68] sm:$0xff] %v2218_v26  ;;  %v2217_v30 = vmul.f32 0.23570226, %v2201_v24  ;;  %v2204_v54 = vadd.f32 %v3001_v25, %v1974_v36  ;;  %v1973_v39 = vadd.f32 %v1950_v14, %v1743_v6 }
 0x172   : > { %2233 = vst [vmem:[%s3888_s24 + $0x60] sm:$0xff] %v2217_v30  ;;  %v2220_v11 = vmul.f32 0.23570226, %v2204_v54  ;;  %v2203_v23 = vadd.f32 %v2180_v5, %v1973_v39 }
 0x174   : > { %2236 = vst [vmem:[%s3888_s24 + $0x78] sm:$0xff] %v2220_v11  ;;  %v2219_v29 = vmul.f32 0.23570226, %v2203_v23 }
 0x176   : > { %2235 = vst [vmem:[%s3888_s24 + $0x70] sm:$0xff] %v2219_v29 }
 0x177   : > { %3091 = shalt.err (!%p3088_p6)
}
 0x178   : > { %s3092_s17 = scalar_lea.hbm %s3950_s3, 2048  ;;  %s3096_s24 = scalar_lea.hbm %s4011_s2, 8192 }
 0x179   : > { %p3093_p7 = scmp.ne.s32.totalorder %s3950_s3, %s3092_s17  ;;  %p3097_p11 = scmp.lt.s32.totalorder %s3950_s3, %s4011_s2 }
 0x17a   : > { %p3098_p12 = scmp.lt.s32.totalorder %s3096_s24, %s3092_s17 }
 0x17b   : > { %p3094_p9 = pnand %p3093_p7, %p3241_p3 }
 0x17c   : > { %p3099_p13 = por %p3098_p12, %p3097_p11 }
 0x17d   : > { %p3095_p10 = pneg %p3094_p9 }
 0x17f   : > { %p3100_p0 = pnand %p3099_p13, %p3095_p10 }
 0x181   : > { %3103 = shalt.err (!%p3100_p0)
}
 0x182   : > { %s3173_s28 = smov 128   ;;  %s3174_s12 = smov 8  }
 0x183   : > { %3005 = dma.vmem_to_hbm [thread:$0]  (%p3241_p3), %s3952_s13, 2048, %s3950_s3, %s3958_s4, %s3173_s28, %s3173_s28, %s3174_s12  }
 0x184 PF: > { %p3011_p1 = scmp.ge.s32.totalorder %s3170_s16, 2  ;;  %s2268_s29 = sand.u32 1, %s3142_s9  }
 0x185   : > { %s2269_s30 = scalar_lea.sflag [#allocation3], %s2268_s29 }
 0x186   : > { %p3008_p2 = pnand %p3011_p1, %p3250_p8 }
 0x188   : > { %p3009_p4 = pneg %p3008_p2 }
 0x18a   : > { %3137 = dma.done.wait (%p3009_p4), %s2269_s30, 2048  }
 0x18b   : > { %3139 = vsyncadd (%p3009_p4), %s2269_s30, 4294965248  ;;  %s15_s16 = sadd.s32 1, %s3170_s16   ;;  %s4052_s9 = smov %s3146_s10 }
 0x18c   : > { %p12_p5 = scmp.ge.s32.totalorder %s15_s16, 6   ;;  %s4053_s10 = smov %s3150_s11 }
 0x18d   : > { %s4054_s11 = smov %s3259_s27  ;;  %s4055_s12 = smov %s3162_s14 }
 0x18e   : > { %s4056_s13 = smov %s3166_s15  ;;  %s4057_s14 = smov %s4060_s19 }
 0x18f   : > { %s4058_s15 = smov %s4064_s20  ;;  %14 = sbr.rel (!%p12_p5) target bundleno = 5 (0x5), region = 74 }
 0x194   :  { %2274 = vsyncpa [#allocation3], 1 }
 0x195   :  { %2276 = vsyncpa [#allocation3 + $0x1], 1 }

</bundles_post_ra>
